<compile_context>
chip_gen: v7x
topology: tpu7x:2x2x1
jax: 0.10.0
libtpu: 0.0.40
codegen_flags: <defaults>
</compile_context>

<pallas_src>
import functools
import math

import numpy as np

import jax
import jax.numpy as jnp
from jax import lax
from jax.experimental import pallas as pl
from jax.experimental.pallas import tpu as pltpu


# -----------------------------------------------------------------------------
# Pallas kernel: fused sine/cosine positional embedding for all n channels.
#   out[:, c*d + j] = sin(pos[:, c] * 2*pi / dim_t[j] + (j % 2) * pi/2)
# which equals the PyTorch stack((a[...,0::2].sin(), a[...,1::2].cos()), 3)
# .flatten(2) semantics, since dim_t[2k] == dim_t[2k+1] and cos(x)=sin(x+pi/2).
# -----------------------------------------------------------------------------
def _sine_pos_embed_kernel(pos_ref, coef_ref, out_ref, *, num_pos_feats,
                           n_channels):
    # pos_ref  : [TILE_M, n_channels]        rows on sublanes
    # coef_ref : [2, num_pos_feats]          row0 = 2*pi/dim_t, row1 = phase
    # out_ref  : [TILE_M, n_channels * num_pos_feats]   lane-dense
    d = num_pos_feats
    inv = coef_ref[0:1, :]                 # (1, d)  precomputed reciprocal
    phase = coef_ref[1:2, :]               # (1, d)  (j % 2) * pi/2
    pos = pos_ref[...].astype(jnp.float32)  # (TILE_M, n)
    for c in range(n_channels):            # static unrolled loop (n is tiny)
        x = pos[:, c:c + 1]                               # (TILE_M, 1)
        angle = x * inv + phase                           # VPU fma, lane bcast
        out_ref[:, c * d:(c + 1) * d] = jnp.sin(angle).astype(out_ref.dtype)


def _round_up(x, m):
    return ((x + m - 1) // m) * m


def _sine_pos_embed_fused(pos_2d, num_pos_feats, temperature,
                          out_dtype=jnp.float32):
    """pos_2d: [M, n] float32 -> [M, n*num_pos_feats] via one tiled Pallas call."""
    M, n = pos_2d.shape
    d = num_pos_feats

    # Host-side (trace-time) constants: reciprocal of dim_t and the sin/cos
    # phase, so the kernel never touches jnp.power / divide.
    j = np.arange(d, dtype=np.float64)
    dim_t = np.power(float(temperature), 2.0 * np.floor(j / 2.0) / float(d))
    inv = (2.0 * math.pi) / dim_t
    phase = (np.arange(d) % 2).astype(np.float64) * (math.pi / 2.0)
    coef = jnp.asarray(np.stack([inv, phase], axis=0), dtype=jnp.float32)  # (2,d)

    # Tile the position (row) axis: <=512 rows per block, padded to a multiple
    # of the tile so the (8,128) sublane constraint and grid division hold.
    M_pad = max(8, _round_up(M, 8))
    tile_m = min(512, M_pad)
    M_pad = _round_up(M_pad, tile_m)
    if M_pad != M:
        pos_p = jnp.zeros((M_pad, n), jnp.float32).at[:M, :].set(pos_2d)
    else:
        pos_p = pos_2d

    kernel = functools.partial(_sine_pos_embed_kernel,
                               num_pos_feats=d, n_channels=n)
    out = pl.pallas_call(
        kernel,
        out_shape=jax.ShapeDtypeStruct((M_pad, n * d), out_dtype),
        grid=(M_pad // tile_m,),
        in_specs=[
            pl.BlockSpec((tile_m, n), lambda i: (i, 0)),
            pl.BlockSpec((2, d), lambda i: (0, 0)),
        ],
        out_specs=pl.BlockSpec((tile_m, n * d), lambda i: (i, 0)),
        compiler_params=pltpu.CompilerParams(
            dimension_semantics=("parallel",)),
    )(pos_p, coef)
    return out[:M]


def get_sine_pos_embed(pos_tensor, num_pos_feats=128, temperature=10000,
                       exchange_xy=True):
    """JAX/Pallas port of get_sine_pos_embed.

    pos_tensor: [..., n]  ->  [..., n * num_pos_feats]
    """
    lead = pos_tensor.shape[:-1]
    n = pos_tensor.shape[-1]
    flat = pos_tensor.reshape((-1, n)).astype(jnp.float32)       # (M, n)
    if exchange_xy and n >= 2:
        # channel swap handled as a cheap column permutation of the tiny input,
        # so the kernel still writes one contiguous lane-dense output slab.
        perm = jnp.asarray([1, 0] + list(range(2, n)), dtype=jnp.int32)
        flat = flat[:, perm]
    out = _sine_pos_embed_fused(flat, num_pos_feats, temperature)  # (M, n*d)
    return out.reshape(lead + (n * num_pos_feats,))


# Pure-jnp reference (mirrors the PyTorch implementation) for numerics checks.
def _ref_sine_pos_embed(pos_tensor, num_pos_feats=128, temperature=10000,
                        exchange_xy=True):
    scale = 2.0 * math.pi
    dim_t = jnp.arange(num_pos_feats, dtype=jnp.float32)
    dim_t = temperature ** (2.0 * jnp.floor(dim_t / 2.0) / num_pos_feats)

    def sine_func(x):                       # x: [..., 1]
        a = x * scale / dim_t               # [..., num_pos_feats]
        s = jnp.stack((jnp.sin(a[..., 0::2]), jnp.cos(a[..., 1::2])), axis=-1)
        return s.reshape(s.shape[:-2] + (num_pos_feats,))

    res = [sine_func(pos_tensor[..., c:c + 1])
           for c in range(pos_tensor.shape[-1])]
    if exchange_xy and len(res) >= 2:
        res[0], res[1] = res[1], res[0]
    return jnp.concatenate(res, axis=-1)


# -----------------------------------------------------------------------------
# TransformerEncoder (container) — mirrors the reference forward control flow.
# -----------------------------------------------------------------------------
class TransformerEncoderPallas:
    def __init__(self, num_layers=2, d_model=256, num_queries=300,
                 enc_layer_share=False, has_text_layers=True,
                 has_fusion_layers=True):
        # The reference module owns no parameters itself (query_scale=None); the
        # sub-layers are externally supplied nn.Modules.
        # TODO(synk): encoder_layer / text_enhance_layer / feature_fusion_layer
        # are external constructor arguments whose definitions are not in this
        # file; they are modeled as identity passes below.  When implemented for
        # real, they should be fused MXU-aligned Pallas kernels (256-wide tiles
        # on v6e/v7x, 128 on v5e) consuming batch-first channel-last tensors.
        self.num_layers = num_layers
        self.d_model = d_model
        self.num_queries = num_queries
        self.query_scale = None
        if num_layers > 0:
            self.layers = [self._identity_encoder_layer] * num_layers
            self.text_layers = ([self._identity_text_layer] * num_layers
                                if has_text_layers else [])
            self.fusion_layers = ([self._identity_fusion_layer] * num_layers
                                  if has_fusion_layers else [])
        else:
            self.layers, self.text_layers, self.fusion_layers = [], [], []

    # --- external-layer stand-ins -------------------------------------------
    @staticmethod
    def _identity_fusion_layer(v, l, attention_mask_v, attention_mask_l):
        # TODO(synk): BiAttentionBlock (image<->text fusion) is defined outside this file.
        return v, l

    @staticmethod
    def _identity_text_layer(src, src_mask, src_key_padding_mask, pos):
        # TODO(synk): text_enhance_layer (vanilla transformer encoder layer) is external.
        return src

    @staticmethod
    def _identity_encoder_layer(src, pos, key_padding_mask):
        # TODO(synk): deformable encoder layer is external; the reference forward
        # also uses undefined names reference_points / spatial_shapes /
        # level_start_index.
        return src

    # --- forward --------------------------------------------------------------
    def __call__(self, src, pos, key_padding_mask, memory_text=None,
                 text_attention_mask=None, pos_text=None,
                 text_self_attention_masks=None, position_ids=None):
        output = src
        if self.text_layers and memory_text is not None:
            bs, n_text, _ = memory_text.shape
            if pos_text is None and position_ids is None:
                # The arange positions are identical for every batch element:
                # run the Pallas kernel once on [n_text, 1] and broadcast across
                # batch instead of tiling bs copies through the kernel.
                pos_seq = jnp.arange(n_text, dtype=jnp.float32)[:, None]
                pos_text = jnp.broadcast_to(
                    get_sine_pos_embed(pos_seq, num_pos_feats=256,
                                       exchange_xy=False)[None],
                    (bs, n_text, 256))
            if position_ids is not None:
                pos_text = get_sine_pos_embed(position_ids[..., None],
                                              num_pos_feats=256,
                                              exchange_xy=False)

        for layer_id, layer in enumerate(self.layers):
            if self.fusion_layers:
                output, memory_text = self.fusion_layers[layer_id](
                    v=output, l=memory_text,
                    attention_mask_v=key_padding_mask,
                    attention_mask_l=text_attention_mask)
            if self.text_layers:
                # Batch-first kept end-to-end: the reference's transpose(0,1)
                # round-trip is pure layout churn and is dropped; the real
                # text_enhance_layer kernel should consume [bs, n_text, d].
                memory_text = self.text_layers[layer_id](
                    src=memory_text,
                    src_mask=(jnp.logical_not(text_self_attention_masks)
                              if text_self_attention_masks is not None else None),
                    src_key_padding_mask=text_attention_mask,
                    pos=pos_text)
            output = layer(src=output, pos=pos,
                           key_padding_mask=key_padding_mask)
        return output, memory_text


# -----------------------------------------------------------------------------
# Demo / smoke test
# -----------------------------------------------------------------------------
if __name__ == "__main__":
    key = jax.random.PRNGKey(0)
    k1, k2, k3, k4, k5 = jax.random.split(key, 5)

    bs, hw, d_model, n_text = 2, 16, 256, 8

    src = jax.random.normal(k1, (bs, hw, d_model), dtype=jnp.float32)
    pos = jax.random.normal(k2, (bs, hw, d_model), dtype=jnp.float32)
    key_padding_mask = jnp.zeros((bs, hw), dtype=bool)
    memory_text = jax.random.normal(k3, (bs, n_text, d_model), dtype=jnp.float32)
    text_attention_mask = jnp.zeros((bs, n_text), dtype=bool)
    text_self_attention_masks = jnp.ones((bs, n_text, n_text), dtype=bool)

    encoder = TransformerEncoderPallas(num_layers=2, d_model=d_model,
                                       num_queries=300,
                                       has_text_layers=True,
                                       has_fusion_layers=True)

    output, memory_text_out = encoder(
        src=src, pos=pos, key_padding_mask=key_padding_mask,
        memory_text=memory_text, text_attention_mask=text_attention_mask,
        pos_text=None, text_self_attention_masks=text_self_attention_masks,
        position_ids=None)

    output = jax.block_until_ready(output)
    memory_text_out = jax.block_until_ready(memory_text_out)
    assert output.shape == (bs, hw, d_model)
    assert memory_text_out.shape == (bs, n_text, d_model)

    # --- numerics: Pallas sine-pos-embed kernel vs pure-jnp reference --------
    # (1) the text-position path used in forward (arange, 1 chan, 256 feats).
    pos_t = jnp.tile(jnp.arange(n_text, dtype=jnp.float32)[None, :, None],
                     (bs, 1, 1))
    emb_pallas = jax.block_until_ready(
        get_sine_pos_embed(pos_t, num_pos_feats=256, exchange_xy=False))
    emb_ref = _ref_sine_pos_embed(pos_t, num_pos_feats=256, exchange_xy=False)
    assert emb_pallas.shape == (bs, n_text, 256)
    assert jnp.allclose(emb_pallas, emb_ref, atol=1e-4), "arange-path mismatch"

    # (2) 2-channel x/y positions with exchange_xy=True (default signature).
    xy = jax.random.uniform(k4, (bs, n_text, 2), dtype=jnp.float32)
    emb2_pallas = jax.block_until_ready(
        get_sine_pos_embed(xy, num_pos_feats=128, exchange_xy=True))
    emb2_ref = _ref_sine_pos_embed(xy, num_pos_feats=128, exchange_xy=True)
    assert emb2_pallas.shape == (bs, n_text, 256)
    assert jnp.allclose(emb2_pallas, emb2_ref, atol=1e-4), "xy-path mismatch"

    # (3) long sequence to exercise the tiled (grid > 1) + padding path.
    long_pos = jax.random.normal(k5, (1, 1100, 1), dtype=jnp.float32)
    emb3_pallas = jax.block_until_ready(
        get_sine_pos_embed(long_pos, num_pos_feats=128, exchange_xy=False))
    emb3_ref = _ref_sine_pos_embed(long_pos, num_pos_feats=128,
                                   exchange_xy=False)
    assert emb3_pallas.shape == (1, 1100, 128)
    assert jnp.allclose(emb3_pallas, emb3_ref, atol=1e-4), "tiled-path mismatch"

    print("KERNEL_OK")
</pallas_src>

<mosaic_0001>
module attributes {stable_mosaic.version = 11 : i64} {
  func.func @_sine_pos_embed_kernel(%arg0: i32, %arg1: memref<8x1xf32, #tpu.memory_space<vmem>>, %arg2: memref<2x256xf32, #tpu.memory_space<vmem>>, %arg3: memref<8x256xf32, #tpu.memory_space<vmem>>) attributes {dimension_semantics = [#tpu.dimension_semantics<parallel>], iteration_bounds = array<i64: 1>, scalar_prefetch = 0 : i64, scratch_operands = 0 : i64, tpu.core_type = #tpu.core_type<tc>, window_params = [{transform_indices = @transform_0, window_bounds = array<i64: 8, 1>}, {pipeline_mode = #tpu.pipeline_mode<synchronous>, transform_indices = @transform_1, window_bounds = array<i64: 2, 256>}, {transform_indices = @transform_2, window_bounds = array<i64: 8, 256>}]} {
    %c0 = arith.constant 0 : index
    %c0_0 = arith.constant 0 : index
    %0 = vector.load %arg2[%c0, %c0_0] : memref<2x256xf32, #tpu.memory_space<vmem>>, vector<1x256xf32>
    %c1 = arith.constant 1 : index
    %c0_1 = arith.constant 0 : index
    %1 = vector.load %arg2[%c1, %c0_1] : memref<2x256xf32, #tpu.memory_space<vmem>>, vector<1x256xf32>
    %c0_2 = arith.constant 0 : index
    %c0_3 = arith.constant 0 : index
    %2 = vector.load %arg1[%c0_2, %c0_3] : memref<8x1xf32, #tpu.memory_space<vmem>>, vector<8x1xf32>
    %3 = vector.broadcast %2 : vector<8x1xf32> to vector<8x256xf32>
    %4 = vector.broadcast %0 : vector<1x256xf32> to vector<8x256xf32>
    %5 = arith.mulf %3, %4 : vector<8x256xf32>
    %6 = vector.broadcast %1 : vector<1x256xf32> to vector<8x256xf32>
    %7 = arith.addf %5, %6 : vector<8x256xf32>
    %8 = math.sin %7 : vector<8x256xf32>
    %c0_4 = arith.constant 0 : index
    %c0_5 = arith.constant 0 : index
    %9 = vector.load %arg3[%c0_4, %c0_5] : memref<8x256xf32, #tpu.memory_space<vmem>>, vector<8x256xf32>
    tpu.vector_store %arg3[%c0_4, %c0_5], %8 {strides = array<i32>} : memref<8x256xf32, #tpu.memory_space<vmem>>, vector<8x256xf32>,
    return
  }
  func.func @transform_0(%arg0: i32) -> (i32, i32) {
    %c0_i32 = arith.constant 0 : i32
    %c0_i32_0 = arith.constant 0 : i32
    return %arg0, %c0_i32 : i32, i32
  }
  func.func @transform_1(%arg0: i32) -> (i32, i32) {
    %c0_i32 = arith.constant 0 : i32
    %c0_i32_0 = arith.constant 0 : i32
    %c0_i32_1 = arith.constant 0 : i32
    return %c0_i32, %c0_i32_0 : i32, i32
  }
  func.func @transform_2(%arg0: i32) -> (i32, i32) {
    %c0_i32 = arith.constant 0 : i32
    %c0_i32_0 = arith.constant 0 : i32
    return %arg0, %c0_i32 : i32, i32
  }
}

</mosaic_0001>

<bundles_post_ra>
// kernel: tpu_custom_call.1
= control target key start
LH: loop header
LB: loop body
LE: loop exit
PB: predicated region body
PF: predicated region fallthrough
CT: control target
= control target key end

     0   :  { %v329_v1 = vmov 0   ;;  %s435_s0 = inlined_call_operand.vmem [shape: f32[8,1], index: 0, kind: input, shape index: {}]   ;;  %s436_s1 = inlined_call_operand.vmem [shape: f32[2,256], index: 1, kind: input, shape index: {}]   ;;  %s437_s2 = inlined_call_operand.hbm [shape: f32[8,256], index: 2, kind: output, shape index: {}]  }
   0x1   :  { %v15_v0 = vld [vmem:[%s435_s0] sm:$0xff]  ;;  %296 = vset.pattern.permute.xlu0 %v329_v1 }
   0x2   :  { %18 = vperm.xlu0 %296, %v15_v0  }
   0x3   :  { %7 = vsyncpa [#allocation3], 0  ;;  %v22_v2 = vlaneseq  ;;  %v12_v6 = vld [vmem:[%s436_s1] ss:$2 sm:$0x3]  ;;  %s336_s0 = smov [#allocation2]  }
   0x4   :  { %v271_v7 = vld [vmem:[%s436_s1 + $0x1] ss:$2 sm:$0x3]  ;;  %v330_v37 = vmov 683565275   ;;  %s263_s1 = sshll.u32 %s336_s0, 4  ;;  %s264_s1 = int_to_ptr.vmem [resolvable:$true] %s263_s1 }
   0x5   :  { %v23_v3 = vshrl.u32 %v22_v2, 7  ;;  %v331_v41 = vmov 2475754826   ;;  %v332_v43 = vmov 2131351028   ;;  %s305_s15 = scalar_lea.vmem %s264_s1, 256  ;;  %p310_p1 = scmp.lt.s32.totalorder %s264_s1, %s264_s1 }
   0x6   :  { %v333_v45 = vmov 2102212464   ;;  %v334_v47 = vmov 920167782   ;;  %v335_v54 = vmov 1326507024   ;;  %p306_p0 = scmp.ne.s32.totalorder %s264_s1, %s305_s15  ;;  %p311_p2 = scmp.lt.s32.totalorder %s305_s15, %s305_s15 }
   0x7   :  { %v24_v4 = vsub.s32 0, %v23_v3  ;;  %v28_v5 = vsub.s32 1, %v23_v3 }
   0x8   :  { %p312_p3 = por %p311_p2, %p310_p1 }
   0x9   :  { %v25_v8 = vrot.slane %v12_v6, %v24_v4  ;;  %v29_v9 = vrot.slane %v12_v6, %v28_v5  ;;  %v38_v10 = vrot.slane %v271_v7, %v24_v4  ;;  %v42_v11 = vrot.slane %v271_v7, %v28_v5 }
   0xa   :  { %p313_p4 = pnand %p312_p3, %p306_p0 }
  0x81   :  { %v19_v12 = vpop.permute.xlu0 %18 }
  0x82   :  { %v32_v13 = vmul.f32 %v25_v8, %v19_v12  ;;  %v33_v14 = vmul.f32 %v29_v9, %v19_v12 }
  0x84   :  { %v361_v15 = vadd.f32 %v38_v10, %v32_v13  ;;  %v363_v16 = vadd.f32 %v42_v11, %v33_v14 }
  0x86   :  { %v47_v17 = vand.u32 2147483647, %v361_v15  ;;  %v50_v18 = vand.u32 2139095040, %v361_v15  ;;  %v154_v19 = vand.u32 2139095040, %v363_v16  ;;  %v151_v22 = vand.u32 2147483647, %v363_v16 }
  0x87   :  { %vm49_vm14 = vcmp.lt.s32.totalorder %v361_v15, 0 }
  0x88   :  { %v51_v20 = vshrl.u32 %v50_v18, 23  ;;  %v54_v21 = vand.u32 8388607, %v47_v17  ;;  %v155_v23 = vshrl.u32 %v154_v19, 23  ;;  %v373_v28 = vand.u32 8388607, %v151_v22 }
  0x89   :  { %vm48_vm15 = vcmp.le.f32.partialorder %v47_v17, 0.7853982 }
  0x8a   :  { %v272_v24 = vadd.s32 4294967169, %v51_v20  ;;  %v276_v25 = vadd.s32 4294967169, %v155_v23  ;;  %v55_v27 = vor.u32 8388608, %v54_v21  ;;  %v159_v35 = vor.u32 8388608, %v373_v28 }
  0x8c   :  { %v57_v26 = vadd.s32 1, %v272_v24  ;;  %v161_v29 = vadd.s32 1, %v276_v25  ;;  %v375_v34 = vshll.u32 %v55_v27, 8 }
  0x8e   :  { %vm58_vm0 = vcmp.gt.s32.totalorder %v57_v26, 0  ;;  %vm162_vm1 = vcmp.gt.s32.totalorder %v161_v29, 0 }
  0x8f   :  { %v59_v30 = vsel %vm58_vm0, %v57_v26, 0  ;;  %v163_v33 = vsel %vm162_vm1, %v161_v29, 0  ;;  %v199_v29 = vshll.u32 %v159_v35, 8  ;;  %vm153_vm0 = vcmp.lt.s32.totalorder %v363_v16, 0 }
  0x90   :  { %v60_v31 = vshrl.u32 %v59_v30, 5  ;;  %v61_v32 = vand.u32 31, %v59_v30  ;;  %v378_v39 = vshrl.u32 %v163_v33, 5  ;;  %v165_v40 = vand.u32 31, %v163_v33 }
  0x91   :  { %vm152_vm1 = vcmp.le.f32.partialorder %v151_v22, 0.7853982 }
  0x92   :  { %v62_v36 = vsub.s32 32, %v61_v32  ;;  %v64_v38 = vshll.u32 %v330_v37, %v61_v32  ;;  %v67_v42 = vshll.u32 %v331_v41, %v61_v32  ;;  %v70_v44 = vshll.u32 %v332_v43, %v61_v32 }
  0x93   :  { %v73_v46 = vshll.u32 %v333_v45, %v61_v32  ;;  %v76_v48 = vshll.u32 %v334_v47, %v61_v32  ;;  %vm79_vm2 = vcmp.lt.s32.totalorder %v60_v31, 1  ;;  %vm80_vm3 = vcmp.lt.s32.totalorder %v60_v31, 2 }
  0x94   :  { %v65_v49 = vshrl.u32 %v331_v41, %v62_v36  ;;  %v68_v50 = vshrl.u32 %v332_v43, %v62_v36  ;;  %v71_v51 = vshrl.u32 %v333_v45, %v62_v36  ;;  %v63_v52 = vshrl.u32 %v330_v37, %v62_v36 }
  0x95   :  { %v74_v53 = vshrl.u32 %v334_v47, %v62_v36  ;;  %v77_v55 = vshrl.u32 %v335_v54, %v62_v36  ;;  %v166_v59 = vsub.s32 32, %v165_v40  ;;  %vm81_vm4 = vcmp.lt.s32.totalorder %v60_v31, 3 }
  0x96   :  { %v66_v56 = vor.u32 %v65_v49, %v64_v38  ;;  %v69_v57 = vor.u32 %v68_v50, %v67_v42  ;;  %v72_v58 = vor.u32 %v71_v51, %v70_v44  ;;  %vm82_vm5 = vcmp.lt.s32.totalorder %v60_v31, 4 }
  0x97   :  { %v75_v60 = vor.u32 %v74_v53, %v73_v46  ;;  %v78_v61 = vor.u32 %v77_v55, %v76_v48  ;;  %v168_v5 = vshll.u32 %v330_v37, %v165_v40  ;;  %v169_v8 = vshrl.u32 %v331_v41, %v166_v59 }
  0x98   :  { %v83_v62 = vsel %vm79_vm2, %v63_v52, %v66_v56  ;;  %v84_v63 = vsel %vm82_vm5, %v72_v58, 2102212464  ;;  %v87_v0 = vsel %vm79_vm2, %v66_v56, %v69_v57  ;;  %v91_v1 = vsel %vm79_vm2, %v69_v57, %v72_v58 }
  0x99   :  { %v85_v2 = vsel %vm81_vm4, %v69_v57, %v84_v63  ;;  %v88_v3 = vsel %vm82_vm5, %v75_v60, 920167782  ;;  %v92_v4 = vsel %vm82_vm5, %v78_v61, 1326507024  ;;  %v171_v9 = vshll.u32 %v331_v41, %v165_v40 }
  0x9a   :  { %v89_v6 = vsel %vm81_vm4, %v72_v58, %v88_v3  ;;  %v93_v7 = vsel %vm81_vm4, %v75_v60, %v92_v4  ;;  %v86_v10 = vsel %vm80_vm3, %v83_v62, %v85_v2  ;;  %v172_v13 = vshrl.u32 %v332_v43, %v166_v59 }
  0x9b   :  { %v90_v11 = vsel %vm80_vm3, %v87_v0, %v89_v6  ;;  %v94_v12 = vsel %vm80_vm3, %v91_v1, %v93_v7  ;;  %v170_v21 = vor.u32 %v169_v8, %v168_v5  ;;  %v174_v24 = vshll.u32 %v332_v43, %v165_v40 }
  0x9c   :  { %v387_v14 = vmul.u32.u64.low %v375_v34, %v94_v12  ;;  %v388_v18 = vmul.u32.u64.high %v375_v34, %v94_v12, %v387_v14  ;;  %v391_v19 = vmul.u32.u64.low %v375_v34, %v90_v11  ;;  %v392_v20 = vmul.u32.u64.high %v375_v34, %v90_v11, %v391_v19 }
  0x9d   :  { %v173_v23 = vor.u32 %v172_v13, %v171_v9  ;;  %v175_v25 = vshrl.u32 %v333_v45, %v166_v59  ;;  %v177_v26 = vshll.u32 %v333_v45, %v165_v40  ;;  %v178_v27 = vshrl.u32 %v334_v47, %v166_v59 }
  0x9e   :  { %v181_v28 = vshrl.u32 %v335_v54, %v166_v59  ;;  %v102_v30 = vmul.u32 %v375_v34, %v86_v10  ;;  %v167_v31 = vshrl.u32 %v330_v37, %v166_v59  ;;  %v180_v33 = vshll.u32 %v334_v47, %v165_v40 }
  0x9f   :  { %v176_v32 = vor.u32 %v175_v25, %v174_v24  ;;  %vm104_vm6 = vc.u32 %v388_v18, %v391_v19  ;;  %v105_v36 = vadd.s32 1, %v392_v20  ;;  %v179_v38 = vor.u32 %v178_v27, %v177_v26 }
  0xa0   :  { %vm183_vm7 = vcmp.lt.s32.totalorder %v378_v39, 1  ;;  %v182_v41 = vor.u32 %v181_v28, %v180_v33  ;;  %vm185_vm8 = vcmp.lt.s32.totalorder %v378_v39, 3  ;;  %vm186_vm9 = vcmp.lt.s32.totalorder %v378_v39, 4 }
  0xa1   :  { %v191_v42 = vsel %vm183_vm7, %v170_v21, %v173_v23  ;;  %v106_v35 = vsel %vm104_vm6, %v105_v36, %v392_v20  ;;  %v188_v43 = vsel %vm186_vm9, %v176_v32, 2102212464  ;;  %v192_v34 = vsel %vm186_vm9, %v179_v38, 920167782 }
  0xa2   :  { %v195_v37 = vsel %vm183_vm7, %v173_v23, %v176_v32  ;;  %v107_v44 = vadd.s32 %v106_v35, %v102_v30  ;;  %vm184_vm10 = vcmp.lt.s32.totalorder %v378_v39, 2  ;;  %v193_v40 = vsel %vm185_vm8, %v176_v32, %v192_v34 }
  0xa3   :  { %v196_v45 = vsel %vm186_vm9, %v182_v41, 1326507024  ;;  %v187_v46 = vsel %vm183_vm7, %v167_v31, %v170_v21  ;;  %v189_v47 = vsel %vm185_vm8, %v173_v23, %v188_v43  ;;  %v194_v48 = vsel %vm184_vm10, %v191_v42, %v193_v40 }
  0xa4   :  { %v197_v49 = vsel %vm185_vm8, %v179_v38, %v196_v45  ;;  %v108_v50 = vadd.s32 536870912, %v107_v44  ;;  %v402_v52 = vmul.u32.u64.low %v199_v29, %v194_v48  ;;  %v403_v53 = vmul.u32.u64.high %v199_v29, %v194_v48, %v402_v52 }
  0xa5   :  { %v198_v51 = vsel %vm184_vm10, %v195_v37, %v197_v49  ;;  %v190_v57 = vsel %vm184_vm10, %v187_v46, %v189_v47  ;;  %v103_v9 = vadd.s32 %v391_v19, %v388_v18  ;;  %vm139_vm5 = vweird.f32 %v361_v15 }
  0xa6   :  { %v405_v54 = vmul.u32.u64.low %v199_v29, %v198_v51  ;;  %v406_v55 = vmul.u32.u64.high %v199_v29, %v198_v51, %v405_v54  ;;  %v109_v56 = vshrl.u32 %v108_v50, 30  ;;  %v209_v59 = vadd.s32 1, %v403_v53 }
  0xa7   :  { %v206_v39 = vmul.u32 %v199_v29, %v190_v57  ;;  %vm243_vm9 = vweird.f32 %v363_v16 }
  0xa8   :  { %v110_v58 = vshll.u32 %v109_v56, 30  ;;  %vm208_vm11 = vc.u32 %v406_v55, %v402_v52  ;;  %v207_v30 = vadd.s32 %v402_v52, %v406_v55  ;;  %v133_v19 = vsub.s32 4, %v109_v56 }
  0xa9   :  { %v210_v61 = vsel %vm208_vm11, %v209_v59, %v403_v53 }
  0xaa   :  { %v111_v60 = vsub.s32 %v107_v44, %v110_v58  ;;  %v211_v62 = vadd.s32 %v210_v61, %v206_v39  ;;  %v134_v34 = vsel %vm49_vm14, %v133_v19, %v109_v56 }
  0xab   :  { %v136_v46 = vsel %vm48_vm15, 0, %v134_v34 }
  0xac   :  { %v113_v63 = vsub.s32 0, %v111_v60  ;;  %v212_v0 = vadd.s32 536870912, %v211_v62  ;;  %v140_v49 = vadd.s32 3, %v136_v46 }
  0xae   :  { %v273_v1 = vmin.u32 %v113_v63, %v111_v60  ;;  %v213_v2 = vshrl.u32 %v212_v0, 30  ;;  %v141_v52 = vand.u32 3, %v140_v49 }
  0xb0   :  { %v115_v3 = vclz %v273_v1  ;;  %v214_v4 = vshll.u32 %v213_v2, 30  ;;  %v237_v48 = vsub.s32 4, %v213_v2  ;;  %vm146_vm2 = vcmp.eq.s32.totalorder %v141_v52, 2 }
  0xb1   :  { %vm143_vm3 = vcmp.eq.s32.totalorder %v141_v52, 0  ;;  %vm142_vm4 = vcmp.lt.s32.totalorder %v141_v52, 2 }
  0xb2   :  { %v274_v5 = vadd.s32 4294967294, %v115_v3  ;;  %v215_v6 = vsub.s32 %v211_v62, %v214_v4  ;;  %v238_v17 = vsel %vm153_vm0, %v237_v48, %v213_v2 }
  0xb3   :  { %v240_v55 = vsel %vm152_vm1, 0, %v238_v17 }
  0xb4   :  { %vm275_vm12 = vcmp.lt.s32.totalorder %v274_v5, 0  ;;  %v217_v8 = vsub.s32 0, %v215_v6  ;;  %v244_v39 = vadd.s32 3, %v240_v55 }
  0xb5   :  { %v118_v7 = vsel %vm275_vm12, 0, %v274_v5 }
  0xb6   :  { %v119_v10 = vsub.s32 32, %v118_v7  ;;  %v123_v11 = vsub.s32 4294967266, %v118_v7  ;;  %v277_v12 = vmin.u32 %v217_v8, %v215_v6  ;;  %v120_v13 = vshll.u32 %v111_v60, %v118_v7 }
  0xb7   :  { %v245_v62 = vand.u32 3, %v244_v39 }
  0xb8   :  { %v121_v14 = vshrl.u32 %v103_v9, %v119_v10  ;;  %v124_v20 = vadd.s32 127, %v123_v11  ;;  %v219_v21 = vclz %v277_v12 }
  0xb9   :  { %vm250_vm6 = vcmp.eq.s32.totalorder %v245_v62, 2  ;;  %vm247_vm7 = vcmp.eq.s32.totalorder %v245_v62, 0  ;;  %vm246_vm8 = vcmp.lt.s32.totalorder %v245_v62, 2 }
  0xba   :  { %v122_v23 = vor.u32 %v121_v14, %v120_v13  ;;  %v125_v24 = vshll.u32 %v124_v20, 23  ;;  %v278_v25 = vadd.s32 4294967294, %v219_v21 }
  0xbc   :  { %v126_v26 = vor.u32 4788187, %v125_v24  ;;  %vm279_vm13 = vcmp.lt.s32.totalorder %v278_v25, 0  ;;  %v129_v28 = vcvt.s32.f32 %v122_v23 }
  0xbd   :  { %v222_v29 = vsel %vm279_vm13, 0, %v278_v25 }
  0xbe   :  { %v127_v27 = vand.u32 2147483647, %v126_v26  ;;  %v223_v31 = vsub.s32 32, %v222_v29  ;;  %v227_v32 = vsub.s32 4294967266, %v222_v29  ;;  %v224_v33 = vshll.u32 %v215_v6, %v222_v29 }
  0xc0   :  { %v130_v18 = vmul.f32 %v129_v28, %v127_v27  ;;  %v225_v36 = vshrl.u32 %v207_v30, %v223_v31  ;;  %v228_v38 = vadd.s32 127, %v227_v32 }
  0xc2   :  { %v131_v41 = vxor.u32 2147483648, %v130_v18  ;;  %v226_v42 = vor.u32 %v225_v36, %v224_v33  ;;  %v229_v35 = vshll.u32 %v228_v38, 23 }
  0xc4   :  { %v132_v43 = vsel %vm49_vm14, %v131_v41, %v130_v18  ;;  %v230_v37 = vor.u32 4788187, %v229_v35  ;;  %v233_v45 = vcvt.s32.f32 %v226_v42 }
  0xc5   :  { %v135_v44 = vsel %vm48_vm15, %v361_v15, %v132_v43 }
  0xc6   :  { %297 = vcosq.f32 %v135_v44  ;;  %v231_v40 = vand.u32 2147483647, %v230_v37 }
  0xc7   :  { %299 = vsinq.f32 %v135_v44 }
  0xc8   :  { %v234_v47 = vmul.f32 %v233_v45, %v231_v40 }
  0xca   :  { %v235_v50 = vxor.u32 2147483648, %v234_v47 }
  0xcc   :  { %v236_v51 = vsel %vm153_vm0, %v235_v50, %v234_v47 }
  0xcd   :  { %v239_v53 = vsel %vm152_vm1, %v363_v16, %v236_v51 }
  0xce   :  { %301 = vcosq.f32 %v239_v53 }
  0xcf   :  { %303 = vsinq.f32 %v239_v53 }
  0xd0   :  { %v298_v54 = vpop.eup %297 }
  0xd1   :  { %v300_v56 = vpop.eup %299  ;;  %v147_v57 = vxor.u32 2147483648, %v298_v54 }
  0xd2   :  { %v144_v58 = vxor.u32 2147483648, %v300_v56 }
  0xd3   :  { %v148_v59 = vsel %vm146_vm2, %v147_v57, %v300_v56 }
  0xd4   :  { %v145_v60 = vsel %vm143_vm3, %v298_v54, %v144_v58 }
  0xd5   :  { %v149_v22 = vsel %vm142_vm4, %v145_v60, %v148_v59 }
  0xd6   :  { %v150_v61 = vsel %vm139_vm5, nan, %v149_v22 }
  0xd7   :  { %255 = vst [vmem:[#allocation2] sm:$0xff] %v150_v61 }
  0xd8   :  { %v302_v63 = vpop.eup %301 }
  0xd9   :  { %v304_v0 = vpop.eup %303  ;;  %v251_v1 = vxor.u32 2147483648, %v302_v63 }
  0xda   :  { %v248_v2 = vxor.u32 2147483648, %v304_v0 }
  0xdb   :  { %v252_v3 = vsel %vm250_vm6, %v251_v1, %v304_v0 }
  0xdc   :  { %v249_v4 = vsel %vm247_vm7, %v302_v63, %v248_v2 }
  0xdd   :  { %v253_v5 = vsel %vm246_vm8, %v249_v4, %v252_v3 }
  0xde   :  { %v254_v15 = vsel %vm243_vm9, nan, %v253_v5 }
  0xdf   :  { %256 = vst [vmem:[#allocation2 + $0x8] sm:$0xff] %v254_v15 }
  0xe0   :  { %316 = shalt.err (!%p313_p4)
}
  0xe1   :  { %s317_s18 = scalar_lea.hbm %s437_s2, 256 }
  0xe2   :  { %p318_p5 = scmp.ne.s32.totalorder %s437_s2, %s317_s18  ;;  %p321_p6 = scmp.lt.u32.totalorder %s317_s18, %s437_s2 }
  0xe4   :  { %p323_p7 = pnand %p321_p6, %p318_p5 }
  0xe6   :  { %326 = shalt.err (!%p323_p7)
}
  0xe7   :  { %266 = dma.vmem_to_hbm [thread:$0]  %s264_s1, 256, %s437_s2, [#allocation3]  }
  0xe8   :  { %327 = dma.done.wait [#allocation3], 256  }
  0xe9   :  { %328 = vsyncadd [#allocation3], 4294967040 }
  0xea   :  { %270 = vsyncpa [#allocation3], 1 }

</bundles_post_ra>
